<compile_context>
chip_gen: v7x
topology: tpu7x:2x2x1
jax: 0.10.0
libtpu: 0.0.40
codegen_flags: <defaults>
</compile_context>

<pallas_src>
import functools

import jax
import jax.numpy as jnp
from jax import lax
from jax.experimental import pallas as pl
from jax.experimental.pallas import tpu as pltpu

LANES = 128
SUBLANES = 8
# 4096 x 128 f32 = 2 MiB per input per grid step -> 8 MiB double-buffered for
# two f32 inputs: safe under the v5e 16 MiB default scoped-VMEM limit and well
# inside v6e/v7x budgets (halved again for bf16 inputs).
MAX_TILE_ROWS = 4096


def _qfocal_kernel(p_ref, t_ref, out_ref, *, gamma, alpha, rows, tile_rows,
                   g_inner, needs_mask):
    o = pl.program_id(0)  # parallel chunk axis (cross-TensorCore on v7x)
    i = pl.program_id(1)  # arbitrary reduction axis

    # The output block index is constant along the reduction axis, so out_ref
    # stays VMEM-resident across it: accumulate directly into it (no scratch).
    @pl.when(i == 0)
    def _():
        out_ref[...] = jnp.zeros_like(out_ref)

    x = p_ref[...].astype(jnp.float32)  # logits (per-tile upcast; inputs may be bf16)
    y = t_ref[...].astype(jnp.float32)  # (soft) targets

    # sigmoid via tanh: one EUP op, no exp + divide.
    p = 0.5 * (1.0 + jnp.tanh(0.5 * x))
    # Stable BCE-with-logits: log1p(exp(-|x|)) == -log(max(p, 1-p)).
    # EUP ops per element: tanh + log + sqrt = 3 (was exp, log1p, div, sqrt).
    bce = jnp.maximum(x, 0.0) - x * y - jnp.log(jnp.maximum(p, 1.0 - p))

    alpha_factor = y * alpha + (1.0 - y) * (1.0 - alpha)
    d = jnp.abs(y - p)
    if gamma == 1.5:
        mod = d * jnp.sqrt(d)  # d**1.5 without a pow (EUP sqrt + VPU mul)
    elif gamma == 2.0:
        mod = d * d
    elif gamma == 1.0:
        mod = d
    else:
        mod = jnp.power(d, gamma)

    loss = bce * alpha_factor * mod

    if needs_mask:
        # Rows past the logical end (partial last block or excess grid steps)
        # contribute exactly zero.  jnp.where is safe even if the padded VMEM
        # region holds garbage (select does not propagate NaN/Inf).
        start_row = (o * g_inner + i) * tile_rows
        r = lax.broadcasted_iota(jnp.int32, loss.shape, 0)
        loss = jnp.where(start_row + r < rows, loss, 0.0)

    # VPU-only partial reduction: fold the (tile_rows, 128) tile into the
    # (8, 128) vreg-shaped output accumulator (no per-step cross-lane reduce).
    out_ref[...] += jnp.sum(loss.reshape(-1, SUBLANES, LANES), axis=0)


def _qfocal_elementwise(x, y, gamma, alpha):
    """Pure-JAX elementwise QFocal loss (tiny tail handling + reference)."""
    x = x.astype(jnp.float32)
    y = y.astype(jnp.float32)
    bce = jnp.maximum(x, 0.0) - x * y + jnp.log1p(jnp.exp(-jnp.abs(x)))
    p = jax.nn.sigmoid(x)
    af = y * alpha + (1.0 - y) * (1.0 - alpha)
    mod = jnp.abs(y - p) ** gamma
    return bce * af * mod


def qfocal_loss(pred, true, gamma=1.5, alpha=0.25, reduction="mean"):
    """QFocalLoss with a BCEWithLogits inner loss; pred/true share any shape."""
    assert pred.shape == true.shape
    if reduction not in ("mean", "sum"):
        # TODO(synk): reduction='none' (elementwise output) path not implemented;
        # YOLOv5 uses the BCEWithLogitsLoss default of 'mean'.
        raise NotImplementedError("reduction must be 'mean' or 'sum'")

    n = pred.size
    # No wrapper-level dtype cast: bf16 inputs go straight to the kernel, which
    # upcasts per tile (halves HBM read traffic in mixed precision).
    p_flat = jnp.ravel(pred)
    t_flat = jnp.ravel(true)

    # Kernel handles the (8*128)-aligned head; the < 1024-element remainder is
    # summed in plain JAX.  No jnp.pad => no extra full-array HBM passes.
    rows_main = (n // (SUBLANES * LANES)) * SUBLANES
    n_main = rows_main * LANES

    total = jnp.zeros((), jnp.float32)

    if n_main < n:
        total = total + jnp.sum(
            _qfocal_elementwise(p_flat[n_main:], t_flat[n_main:], gamma, alpha))

    if rows_main > 0:
        if n_main == n:
            p_head, t_head = p_flat, t_flat  # zero-copy
        else:
            # Only hit when n is not a multiple of 8*128 (one head slice copy).
            p_head, t_head = p_flat[:n_main], t_flat[:n_main]
        p_2d = p_head.reshape(rows_main, LANES)  # free bitcast, no HBM copy
        t_2d = t_head.reshape(rows_main, LANES)

        tile_rows = min(MAX_TILE_ROWS, rows_main)
        total_tiles = pl.cdiv(rows_main, tile_rows)
        # Always split into 2 chunks when there is enough work so the reduction
        # can shard across both TensorCores on v7x (sequential elsewhere).
        g_outer = 2 if total_tiles >= 2 else 1
        g_inner = pl.cdiv(total_tiles, g_outer)
        last_block = total_tiles - 1
        needs_mask = (g_outer * g_inner * tile_rows) != rows_main

        if needs_mask:
            def in_idx(o, i):
                # Clamp so the DMA stays in-bounds; excess / partial coverage is
                # zeroed by the in-kernel row mask.
                return (jnp.minimum(o * g_inner + i, last_block), 0)
        else:
            def in_idx(o, i):
                return (o * g_inner + i, 0)

        kernel = functools.partial(
            _qfocal_kernel, gamma=float(gamma), alpha=float(alpha),
            rows=rows_main, tile_rows=tile_rows, g_inner=g_inner,
            needs_mask=needs_mask)

        partials = pl.pallas_call(
            kernel,
            out_shape=jax.ShapeDtypeStruct((g_outer * SUBLANES, LANES),
                                           jnp.float32),
            grid_spec=pltpu.PrefetchScalarGridSpec(
                num_scalar_prefetch=0,
                grid=(g_outer, g_inner),
                in_specs=[
                    pl.BlockSpec((tile_rows, LANES), in_idx),
                    pl.BlockSpec((tile_rows, LANES), in_idx),
                ],
                out_specs=pl.BlockSpec((SUBLANES, LANES), lambda o, i: (o, 0)),
            ),
            compiler_params=pltpu.CompilerParams(
                dimension_semantics=("parallel", "arbitrary"),
            ),
        )(p_2d, t_2d)

        total = total + jnp.sum(partials)  # tiny cross-lane reduce in wrapper

    if reduction == "mean":
        return (total / jnp.float32(n)).astype(jnp.float32)
    return total.astype(jnp.float32)


if __name__ == "__main__":
    key = jax.random.PRNGKey(0)
    k_pred, k_true = jax.random.split(key)

    # NCHW-shaped logits with soft "quality" targets in [0, 1].
    shape = (2, 4, 16, 16)
    pred = jax.random.normal(k_pred, shape, dtype=jnp.float32)
    true = jax.random.uniform(k_true, shape, dtype=jnp.float32)

    out = qfocal_loss(pred, true, gamma=1.5, alpha=0.25)
    out = jax.block_until_ready(out)

    ref = jnp.mean(_qfocal_elementwise(pred, true, 1.5, 0.25))
    assert jnp.allclose(out, ref, atol=1e-5, rtol=1e-5), (out, ref)

    print("KERNEL_OK")
</pallas_src>

<mosaic_0001>
module attributes {stable_mosaic.version = 11 : i64} {
  func.func @_qfocal_kernel(%arg0: i32, %arg1: i32, %arg2: memref<16x128xf32, #tpu.memory_space<vmem>>, %arg3: memref<16x128xf32, #tpu.memory_space<vmem>>, %arg4: memref<8x128xf32, #tpu.memory_space<vmem>>) attributes {dimension_semantics = [#tpu.dimension_semantics<parallel>, #tpu.dimension_semantics<arbitrary>], iteration_bounds = array<i64: 1, 1>, scalar_prefetch = 0 : i64, scratch_operands = 0 : i64, tpu.core_type = #tpu.core_type<tc>, window_params = [{transform_indices = @transform_0, window_bounds = array<i64: 16, 128>}, {transform_indices = @transform_1, window_bounds = array<i64: 16, 128>}, {transform_indices = @transform_2, window_bounds = array<i64: 8, 128>}]} {
    %c0_i32 = arith.constant 0 : i32
    %0 = arith.cmpi eq, %arg1, %c0_i32 : i32
    %1 = arith.extui %0 : i1 to i32
    %c0_i32_0 = arith.constant 0 : i32
    %2 = arith.cmpi ne, %1, %c0_i32_0 : i32
    scf.if %2 {
      %cst_16 = arith.constant 0.000000e+00 : f32
      %39 = vector.broadcast %cst_16 : f32 to vector<8x128xf32>
      %c0_17 = arith.constant 0 : index
      %c0_18 = arith.constant 0 : index
      %40 = vector.load %arg4[%c0_17, %c0_18] : memref<8x128xf32, #tpu.memory_space<vmem>>, vector<8x128xf32>
      tpu.vector_store %arg4[%c0_17, %c0_18], %39 {strides = array<i32>} : memref<8x128xf32, #tpu.memory_space<vmem>>, vector<8x128xf32>,
    } else {
    }
    %c0 = arith.constant 0 : index
    %c0_1 = arith.constant 0 : index
    %3 = vector.load %arg2[%c0, %c0_1] : memref<16x128xf32, #tpu.memory_space<vmem>>, vector<16x128xf32>
    %c0_2 = arith.constant 0 : index
    %c0_3 = arith.constant 0 : index
    %4 = vector.load %arg3[%c0_2, %c0_3] : memref<16x128xf32, #tpu.memory_space<vmem>>, vector<16x128xf32>
    %cst = arith.constant 5.000000e-01 : f32
    %5 = vector.broadcast %cst : f32 to vector<16x128xf32>
    %6 = arith.mulf %5, %3 : vector<16x128xf32>
    %7 = math.tanh %6 : vector<16x128xf32>
    %cst_4 = arith.constant 1.000000e+00 : f32
    %8 = vector.broadcast %cst_4 : f32 to vector<16x128xf32>
    %9 = arith.addf %8, %7 : vector<16x128xf32>
    %cst_5 = arith.constant 5.000000e-01 : f32
    %10 = vector.broadcast %cst_5 : f32 to vector<16x128xf32>
    %11 = arith.mulf %10, %9 : vector<16x128xf32>
    %cst_6 = arith.constant 0.000000e+00 : f32
    %12 = vector.broadcast %cst_6 : f32 to vector<16x128xf32>
    %13 = arith.maximumf %3, %12 : vector<16x128xf32>
    %14 = arith.mulf %3, %4 : vector<16x128xf32>
    %15 = arith.subf %13, %14 : vector<16x128xf32>
    %cst_7 = arith.constant 1.000000e+00 : f32
    %16 = vector.broadcast %cst_7 : f32 to vector<16x128xf32>
    %17 = arith.subf %16, %11 : vector<16x128xf32>
    %18 = arith.maximumf %11, %17 : vector<16x128xf32>
    %19 = math.log %18 : vector<16x128xf32>
    %20 = arith.subf %15, %19 : vector<16x128xf32>
    %cst_8 = arith.constant 2.500000e-01 : f32
    %21 = vector.broadcast %cst_8 : f32 to vector<16x128xf32>
    %22 = arith.mulf %4, %21 : vector<16x128xf32>
    %cst_9 = arith.constant 1.000000e+00 : f32
    %23 = vector.broadcast %cst_9 : f32 to vector<16x128xf32>
    %24 = arith.subf %23, %4 : vector<16x128xf32>
    %cst_10 = arith.constant 7.500000e-01 : f32
    %25 = vector.broadcast %cst_10 : f32 to vector<16x128xf32>
    %26 = arith.mulf %24, %25 : vector<16x128xf32>
    %27 = arith.addf %22, %26 : vector<16x128xf32>
    %28 = arith.subf %4, %11 : vector<16x128xf32>
    %29 = math.absf %28 : vector<16x128xf32>
    %30 = math.sqrt %29 : vector<16x128xf32>
    %31 = arith.mulf %29, %30 : vector<16x128xf32>
    %32 = arith.mulf %20, %27 : vector<16x128xf32>
    %33 = arith.mulf %32, %31 : vector<16x128xf32>
    %c0_11 = arith.constant 0 : index
    %c0_12 = arith.constant 0 : index
    %34 = vector.load %arg4[%c0_11, %c0_12] : memref<8x128xf32, #tpu.memory_space<vmem>>, vector<8x128xf32>
    %35 = vector.shape_cast %33 : vector<16x128xf32> to vector<2x8x128xf32>
    %cst_13 = arith.constant dense<0.000000e+00> : vector<8x128xf32>
    %36 = vector.multi_reduction <add>, %35, %cst_13 [0] : vector<2x8x128xf32> to vector<8x128xf32>
    %37 = arith.addf %34, %36 : vector<8x128xf32>
    %c0_14 = arith.constant 0 : index
    %c0_15 = arith.constant 0 : index
    %38 = vector.load %arg4[%c0_14, %c0_15] : memref<8x128xf32, #tpu.memory_space<vmem>>, vector<8x128xf32>
    tpu.vector_store %arg4[%c0_14, %c0_15], %37 {strides = array<i32>} : memref<8x128xf32, #tpu.memory_space<vmem>>, vector<8x128xf32>,
    return
  }
  func.func @transform_0(%arg0: i32, %arg1: i32) -> (i32, i32) {
    %c1_i32 = arith.constant 1 : i32
    %0 = arith.muli %arg0, %c1_i32 : i32
    %1 = arith.addi %0, %arg1 : i32
    %c0_i32 = arith.constant 0 : i32
    %c0_i32_0 = arith.constant 0 : i32
    return %1, %c0_i32 : i32, i32
  }
  func.func @transform_1(%arg0: i32, %arg1: i32) -> (i32, i32) {
    %c1_i32 = arith.constant 1 : i32
    %0 = arith.muli %arg0, %c1_i32 : i32
    %1 = arith.addi %0, %arg1 : i32
    %c0_i32 = arith.constant 0 : i32
    %c0_i32_0 = arith.constant 0 : i32
    return %1, %c0_i32 : i32, i32
  }
  func.func @transform_2(%arg0: i32, %arg1: i32) -> (i32, i32) {
    %c0_i32 = arith.constant 0 : i32
    %c0_i32_0 = arith.constant 0 : i32
    return %arg0, %c0_i32 : i32, i32
  }
}

</mosaic_0001>

<bundles_post_ra>
// kernel: tpu_custom_call.1
= control target key start
LH: loop header
LB: loop body
LE: loop exit
PB: predicated region body
PF: predicated region fallthrough
CT: control target
= control target key end

     0   :  { %7 = vsyncpa [#allocation3], 0  ;;  %s283_s0 = inlined_call_operand.hbm [shape: f32[16,128], index: 0, kind: input, shape index: {}]   ;;  %s284_s1 = inlined_call_operand.hbm [shape: f32[16,128], index: 1, kind: input, shape index: {}]   ;;  %s285_s2 = inlined_call_operand.hbm [shape: f32[8,128], index: 2, kind: output, shape index: {}]  }
   0x1   :  { %8 = vsyncpa [#allocation6], 0 }
   0x2   :  { %9 = vsyncpa [#allocation4], 0  ;;  %s227_s9 = smov [#allocation2]   ;;  %s155_s13 = scalar_lea.hbm %s283_s0, 256 }
   0x3   :  { %s19_s10 = sshll.u32 %s227_s9, 4  ;;  %p156_p0 = scmp.ne.s32.totalorder %s283_s0, %s155_s13  ;;  %s20_s10 = int_to_ptr.vmem [resolvable:$true] %s19_s10 }
   0x4   :  { %p159_p1 = scmp.lt.u32.totalorder %s155_s13, %s283_s0 }
   0x6   :  { %p161_p2 = pnand %p159_p1, %p156_p0 }
   0x8   :  { %164 = shalt.err (!%p161_p2)
}
   0x9   :  { %s165_s18 = scalar_lea.vmem %s20_s10, 256  ;;  %p170_p4 = scmp.lt.s32.totalorder %s20_s10, %s20_s10 }
   0xa   :  { %p166_p3 = scmp.ne.s32.totalorder %s20_s10, %s165_s18  ;;  %p171_p5 = scmp.lt.s32.totalorder %s165_s18, %s165_s18 }
   0xc   :  { %p172_p6 = por %p171_p5, %p170_p4 }
   0xe   :  { %p173_p7 = pnand %p172_p6, %p166_p3 }
  0x10   :  { %176 = shalt.err (!%p173_p7)
}
  0x11   :  { %s228_s19 = smov 128   ;;  %s229_s20 = smov 8  }
  0x12   :  { %25 = dma.hbm_to_vmem [thread:$0]  %s283_s0, 256, %s20_s10, [#allocation3], %s228_s19, %s228_s19, %s229_s20  }
  0x13   :  { %s230_s23 = smov [#allocation5]   ;;  %s177_s27 = scalar_lea.hbm %s284_s1, 256 }
  0x14   :  { %s35_s24 = sshll.u32 %s230_s23, 4  ;;  %p178_p8 = scmp.ne.s32.totalorder %s284_s1, %s177_s27  ;;  %s36_s24 = int_to_ptr.vmem [resolvable:$true] %s35_s24 }
  0x15   :  { %p181_p9 = scmp.lt.u32.totalorder %s177_s27, %s284_s1 }
  0x17   :  { %p183_p10 = pnand %p181_p9, %p178_p8 }
  0x19   :  { %186 = shalt.err (!%p183_p10)
}
  0x1a   :  { %s187_s4 = scalar_lea.vmem %s36_s24, 256  ;;  %p192_p12 = scmp.lt.s32.totalorder %s36_s24, %s36_s24 }
  0x1b   :  { %p188_p11 = scmp.ne.s32.totalorder %s36_s24, %s187_s4  ;;  %p193_p13 = scmp.lt.s32.totalorder %s187_s4, %s187_s4 }
  0x1d   :  { %p194_p0 = por %p193_p13, %p192_p12 }
  0x1f   :  { %p195_p1 = pnand %p194_p0, %p188_p11 }
  0x21   :  { %198 = shalt.err (!%p195_p1)
}
  0x22   :  { %41 = dma.hbm_to_vmem [thread:$0]  %s284_s1, 256, %s36_s24, [#allocation6], %s228_s19, %s228_s19, %s229_s20  }
  0x23   :  { %221 = dma.done.wait [#allocation3], 256  }
  0x24   :  { %222 = vsyncadd [#allocation3], 4294967040 }
  0x25   :  { %223 = dma.done.wait [#allocation6], 256  }
  0x26   :  { %224 = vsyncadd [#allocation6], 4294967040  ;;  %v57_v0 = vld [vmem:[#allocation2] sm:$0xff]  ;;  %v58_v1 = vld [vmem:[#allocation2 + $0x8] sm:$0xff]  ;;  %s231_s1 = smov [#allocation7]  }
  0x27   :  { %v61_v2 = vmul.f32 0.5, %v57_v0  ;;  %v62_v3 = vmul.f32 0.5, %v58_v1  ;;  %v59_v7 = vld [vmem:[#allocation5] sm:$0xff]  ;;  %v60_v9 = vld [vmem:[#allocation5 + $0x8] sm:$0xff]  ;;  %v69_v22 = vmax.f32 %v57_v0, 0.0  ;;  %v70_v24 = vmax.f32 %v58_v1, 0.0 }
  0x28   :  { %v87_v20 = vsub.f32 1.0, %v59_v7  ;;  %v88_v21 = vsub.f32 1.0, %v60_v9  ;;  %v71_v23 = vmul.f32 %v59_v7, %v57_v0  ;;  %v72_v25 = vmul.f32 %v60_v9, %v58_v1  ;;  %s127_s6 = sshll.u32 %s231_s1, 4  ;;  %s128_s6 = int_to_ptr.vmem [resolvable:$true] %s127_s6 }
  0x29   :  { %143 = vtanh.f32 %v61_v2  ;;  %v85_v26 = vmul.f32 0.25, %v59_v7  ;;  %v86_v27 = vmul.f32 0.25, %v60_v9  ;;  %s199_s7 = scalar_lea.vmem %s128_s6, 128  ;;  %p204_p3 = scmp.lt.s32.totalorder %s128_s6, %s128_s6 }
  0x2a   :  { %145 = vtanh.f32 %v62_v3  ;;  %v89_v28 = vmul.f32 0.75, %v87_v20  ;;  %v90_v29 = vmul.f32 0.75, %v88_v21  ;;  %v73_v30 = vsub.f32 %v69_v22, %v71_v23  ;;  %p200_p2 = scmp.ne.s32.totalorder %s128_s6, %s199_s7  ;;  %p205_p4 = scmp.lt.s32.totalorder %s199_s7, %s199_s7 }
  0x2b   :  { %v74_v32 = vsub.f32 %v70_v24, %v72_v25 }
  0x2c   :  { %v91_v35 = vadd.f32 %v89_v28, %v85_v26  ;;  %v92_v36 = vadd.f32 %v90_v29, %v86_v27  ;;  %p206_p5 = por %p205_p4, %p204_p3 }
  0x2e   :  { %p207_p6 = pnand %p206_p5, %p200_p2 }
  0x33   :  { %v144_v4 = vpop.eup %143 }
  0x34   :  { %v146_v5 = vpop.eup %145  ;;  %v65_v6 = vadd.f32 1.0, %v144_v4 }
  0x35   :  { %v66_v8 = vadd.f32 1.0, %v146_v5 }
  0x36   :  { %v67_v10 = vmul.f32 0.5, %v65_v6 }
  0x37   :  { %v68_v11 = vmul.f32 0.5, %v66_v8 }
  0x38   :  { %v75_v12 = vsub.f32 1.0, %v67_v10  ;;  %v93_v13 = vsub.f32 %v59_v7, %v67_v10 }
  0x39   :  { %v76_v14 = vsub.f32 1.0, %v68_v11  ;;  %v94_v15 = vsub.f32 %v60_v9, %v68_v11 }
  0x3a   :  { %v77_v16 = vmax.f32 %v67_v10, %v75_v12  ;;  %v95_v17 = vand.u32 2147483647, %v93_v13 }
  0x3b   :  { %v78_v18 = vmax.f32 %v68_v11, %v76_v14  ;;  %v96_v19 = vand.u32 2147483647, %v94_v15 }
  0x3c   :  { %147 = vlog2.f32 %v77_v16  ;;  %vm99_vm0 = vcmp.eq.f32.partialorder %v95_v17, inf  ;;  %vm101_vm1 = vcmp.eq.f32.partialorder %v95_v17, 0.0  ;;  %v102_v39 = vand.u32 2147483648, %v95_v17 }
  0x3d   :  { %149 = vlog2.f32 %v78_v18  ;;  %vm106_vm2 = vcmp.eq.f32.partialorder %v96_v19, inf  ;;  %v109_v43 = vand.u32 2147483648, %v96_v19  ;;  %vm108_vm3 = vcmp.eq.f32.partialorder %v96_v19, 0.0 }
  0x3e   :  { %151 = vrsqrt.f32 %v95_v17 }
  0x3f   :  { %153 = vrsqrt.f32 %v96_v19 }
  0x46   :  { %v148_v31 = vpop.eup %147 }
  0x47   :  { %v150_v33 = vpop.eup %149  ;;  %v80_v34 = vmul.f32 0.6931472, %v148_v31 }
  0x48   :  { %v152_v37 = vpop.eup %151  ;;  %v82_v38 = vmul.f32 0.6931472, %v150_v33 }
  0x49   :  { %v154_v40 = vpop.eup %153  ;;  %v83_v41 = vsub.f32 %v73_v30, %v80_v34  ;;  %v98_v42 = vmul.f32 %v152_v37, %v95_v17 }
  0x4a   :  { %v84_v44 = vsub.f32 %v74_v32, %v82_v38  ;;  %v105_v45 = vmul.f32 %v154_v40, %v96_v19 }
  0x4b   :  { %v100_v46 = vsel %vm99_vm0, %v95_v17, %v98_v42  ;;  %v113_v47 = vmul.f32 %v91_v35, %v83_v41 }
  0x4c   :  { %v103_v48 = vsel %vm101_vm1, %v102_v39, %v100_v46  ;;  %v107_v49 = vsel %vm106_vm2, %v96_v19, %v105_v45  ;;  %v114_v50 = vmul.f32 %v92_v36, %v84_v44 }
  0x4d   :  { %v110_v51 = vsel %vm108_vm3, %v109_v43, %v107_v49  ;;  %v111_v52 = vmul.f32 %v103_v48, %v95_v17 }
  0x4e   :  { %v112_v53 = vmul.f32 %v110_v51, %v96_v19 }
  0x4f   :  { %v115_v54 = vmul.f32 %v113_v47, %v111_v52 }
  0x50   :  { %v116_v55 = vmul.f32 %v114_v50, %v112_v53 }
  0x52   :  { %v118_v56 = vadd.f32 %v116_v55, %v115_v54 }
  0x54   :  { %120 = vst [vmem:[#allocation7] sm:$0xff] %v118_v56 }
  0x55   :  { %210 = shalt.err (!%p207_p6)
}
  0x56   :  { %s211_s10 = scalar_lea.hbm %s285_s2, 128 }
  0x57   :  { %p212_p7 = scmp.ne.s32.totalorder %s285_s2, %s211_s10  ;;  %p215_p8 = scmp.lt.u32.totalorder %s211_s10, %s285_s2 }
  0x59   :  { %p217_p9 = pnand %p215_p8, %p212_p7 }
  0x5b   :  { %220 = shalt.err (!%p217_p9)
}
  0x5c   :  { %130 = dma.vmem_to_hbm [thread:$0]  %s128_s6, 128, %s285_s2, [#allocation4]  }
  0x5d   :  { %225 = dma.done.wait [#allocation4], 128  }
  0x5e   :  { %226 = vsyncadd [#allocation4], 4294967168 }
  0x5f   :  { %134 = vsyncpa [#allocation3], 1 }
  0x60   :  { %135 = vsyncpa [#allocation6], 1 }
  0x61   :  { %136 = vsyncpa [#allocation4], 1 }

</bundles_post_ra>
